<compile_context>
chip_gen: v6e
topology: v6e:2x2x1
jax: 0.10.0
libtpu: 0.0.40
codegen_flags: <defaults>
</compile_context>

<pallas_src>
import functools

import jax
import jax.numpy as jnp
import numpy as np
from jax.experimental import pallas as pl
from jax.experimental.pallas import tpu as pltpu

_LANES = 128
_SUBLANES = 8
_CHUNK = _SUBLANES * _LANES                 # elements per (8,128) vreg tile
_EPS = 1e-4
_LOG_EPS = float(np.log(_EPS))              # log(1e-4)
_LOG_1MEPS = float(np.log1p(-_EPS))         # log(1 - 1e-4)


def _tpu_config():
    """(ncores, tb_cap, vmem_budget, vmem_limit) for the local TPU generation."""
    kind = ""
    try:
        kind = jax.devices()[0].device_kind.lower()
    except Exception:
        pass
    single_tc = any(t in kind for t in ("v5e", "v6e", "lite", "trillium"))
    multi_tc = any(t in kind for t in ("v4", "v5p", "7x", "v7"))
    if single_tc:
        # 1 TensorCore, 128 MiB physical VMEM: big blocks, no megacore split.
        return 1, 512, 48 * 1024 * 1024, 64 * 1024 * 1024
    if multi_tc:
        # 2 TensorCores/chip; v7x has only 64 MiB VMEM per TC -> stay modest.
        return 2, 256, 24 * 1024 * 1024, 32 * 1024 * 1024
    # Unknown chip: safe defaults (serial grid, conservative VMEM).
    return 1, 256, 24 * 1024 * 1024, 32 * 1024 * 1024


def _atts_loss_kernel(*refs, n_preds, need_guard, nblocks, half):
    # refs = pred_0 .. pred_{n-1}, gt, loss_out, npos_out
    pred_refs = refs[:n_preds]
    gt_ref = refs[n_preds]
    loss_ref = refs[n_preds + 1]            # (1, N, 2, 8, 128) resident accumulator
    npos_ref = refs[n_preds + 2]            # (1, 8, 128)       resident accumulator

    @pl.when(pl.program_id(1) == 0)
    def _():
        loss_ref[...] = jnp.zeros_like(loss_ref)
        npos_ref[...] = jnp.zeros_like(npos_ref)

    def body():
        gt = gt_ref[...].astype(jnp.float32)            # (TB, 8, 128)
        pos_mask = gt == 1.0
        neg_mask = gt < 1.0                             # pad value 2.0 -> neither
        omg = 1.0 - gt
        omg2 = omg * omg
        neg_w = omg2 * omg2                             # (1 - gt)^4, two squarings

        # num_pos accumulated once per grid step (identical for every pred).
        npos_ref[0] += jnp.sum(pos_mask.astype(jnp.float32), axis=0)

        # Static unroll: n_preds is a handful of attention maps.
        # TODO(synk): move the pred loop behind lax.fori_loop over a stacked
        # VMEM scratch if n_preds ever grows large enough to cause spills.
        for i in range(n_preds):
            x = pred_refs[i][...].astype(jnp.float32)   # (TB, 8, 128)
            a = jnp.exp(-jnp.abs(x))                    # in (0, 1]
            lh = jnp.log(1.0 + a)                       # softplus(-|x|)
            # log(sigmoid(x)) / log(1-sigmoid(x)); clip-of-log == log-of-clip.
            log_s = jnp.clip(jnp.minimum(x, 0.0) - lh, _LOG_EPS, _LOG_1MEPS)
            log_1ms = jnp.clip(jnp.minimum(-x, 0.0) - lh, _LOG_EPS, _LOG_1MEPS)
            # Focal weights computed on the EUP: exp(2*log y) == y^2 (clipped s).
            w_pos = jnp.exp(2.0 * log_1ms)              # (1 - s)^2
            w_neg = jnp.exp(2.0 * log_s)                # s^2
            pos_l = jnp.where(pos_mask, log_s * w_pos, 0.0)
            neg_l = jnp.where(neg_mask, log_1ms * w_neg * neg_w, 0.0)
            # Full-vreg accumulation: reduce only the leading (tile) axis.
            loss_ref[0, i, 0] += jnp.sum(pos_l, axis=0)
            loss_ref[0, i, 1] += jnp.sum(neg_l, axis=0)

    if need_guard:
        # Megacore overshoot block (odd nblocks split over 2 cores): skip it.
        blk = pl.program_id(0) * half + pl.program_id(1)
        pl.when(blk < nblocks)(body)
    else:
        body()


def atts_loss(atts_list, gt_atts):
    """JAX/Pallas equivalent of atts_loss.forward(outs, targets)."""
    n = len(atts_list)
    assert n >= 1
    m = int(gt_atts.size)

    ncores, tb_cap, vmem_budget, vmem_limit = _tpu_config()

    r8 = -(-m // _CHUNK)                    # (8,128) tiles of real data
    # Row-tile size: biggest block that keeps double-buffered inputs plus the
    # elementwise f32 temporaries under the per-generation VMEM budget.
    per_tile_bytes = (2 * (n + 1) + 12) * _CHUNK * 4
    tb = max(1, min(tb_cap, vmem_budget // per_tile_bytes, r8))
    nblocks = -(-r8 // tb)
    r8_pad = nblocks * tb                   # pad to whole blocks -> no ragged tail
    target_elems = r8_pad * _CHUNK

    half = -(-nblocks // ncores)
    need_guard = (ncores * half) != nblocks # only the megacore-overshoot block
    last_blk = nblocks - 1

    if not jnp.issubdtype(gt_atts.dtype, jnp.floating):
        gt_atts = gt_atts.astype(jnp.float32)

    def to_tiles(x, pad_value):
        x = x.reshape(-1)
        pad = target_elems - x.shape[0]
        if pad:
            # One pad copy only for ragged inputs; aligned inputs reshape free.
            x = jnp.pad(x, (0, pad), constant_values=pad_value)
        return x.reshape(r8_pad, _SUBLANES, _LANES)

    # Preds keep their input dtype (bf16 stays bf16); upcast in-kernel.
    preds = [to_tiles(a, 0.0) for a in atts_list]
    # gt kept in native floating dtype; padded with 2.0 -> neither pos nor neg.
    gt = to_tiles(gt_atts, 2.0)

    def in_map(c, rb):
        # Clamp so the (at most one) overshoot block still DMAs in-bounds data;
        # its compute is skipped by the in-kernel scalar guard.
        return (jnp.minimum(c * half + rb, last_blk), 0, 0)

    kernel = functools.partial(
        _atts_loss_kernel, n_preds=n, need_guard=need_guard,
        nblocks=nblocks, half=half)

    bytes_in = int(sum(int(p.size) * int(p.dtype.itemsize) for p in preds)
                   + int(gt.size) * int(gt.dtype.itemsize))
    bytes_out = int((ncores * n * 2 * _CHUNK + ncores * _CHUNK) * 4)
    cost = pl.CostEstimate(flops=30 * n * m,
                           transcendentals=4 * n * m,
                           bytes_accessed=bytes_in + bytes_out)

    loss_part, npos_part = pl.pallas_call(
        kernel,
        out_shape=(
            jax.ShapeDtypeStruct((ncores, n, 2, _SUBLANES, _LANES), jnp.float32),
            jax.ShapeDtypeStruct((ncores, _SUBLANES, _LANES), jnp.float32),
        ),
        grid_spec=pltpu.PrefetchScalarGridSpec(
            num_scalar_prefetch=0,
            grid=(ncores, half),
            in_specs=[pl.BlockSpec((tb, _SUBLANES, _LANES), in_map)] * (n + 1),
            out_specs=(
                pl.BlockSpec((1, n, 2, _SUBLANES, _LANES),
                             lambda c, rb: (c, 0, 0, 0, 0)),
                pl.BlockSpec((1, _SUBLANES, _LANES),
                             lambda c, rb: (c, 0, 0)),
            ),
        ),
        compiler_params=pltpu.CompilerParams(
            dimension_semantics=("parallel", "arbitrary"),
            vmem_limit_bytes=vmem_limit),
        cost_estimate=cost,
    )(*preds, gt)

    sums = jnp.sum(loss_part, axis=(0, 3, 4))            # (N, 2)
    pos_loss = sums[:, 0]
    neg_loss = sums[:, 1]
    num_pos = jnp.sum(npos_part)
    per_pred = jnp.where(num_pos > 0.0,
                         -(pos_loss + neg_loss) / jnp.maximum(num_pos, 1.0),
                         -neg_loss)
    att_loss = jnp.sum(per_pred) / max(n, 1)
    return att_loss[None]                                # shape (1,), like .unsqueeze(0)


def _ref_atts_loss(atts_list, gt):
    """Pure-JAX reference reproducing the PyTorch module semantics."""
    atts = [jnp.clip(jax.nn.sigmoid(a.astype(jnp.float32)), _EPS, 1.0 - _EPS)
            for a in atts_list]
    gt = gt.astype(jnp.float32)
    pos = gt == 1.0
    neg = gt < 1.0
    neg_w = jnp.where(neg, (1.0 - gt) ** 4, 0.0)
    num_pos = jnp.sum(pos.astype(jnp.float32))
    loss = jnp.float32(0.0)
    for p in atts:
        pos_l = jnp.sum(jnp.where(pos, jnp.log(p) * (1.0 - p) ** 2, 0.0))
        neg_l = jnp.sum(jnp.where(neg, jnp.log(1.0 - p) * p ** 2 * neg_w, 0.0))
        loss = jnp.where(num_pos > 0.0,
                         loss - (pos_l + neg_l) / jnp.maximum(num_pos, 1.0),
                         loss - neg_l)
    return (loss / max(len(atts), 1))[None]


if __name__ == "__main__":
    key = jax.random.PRNGKey(0)
    k1, k2, k3, k4, k5, k6 = jax.random.split(key, 6)

    # Case 1: tile-aligned f32 inputs (2*4*16*16 = 2048 elements).
    B, C, H, W = 2, 4, 16, 16
    att0 = jax.random.normal(k1, (B, C, H, W), jnp.float32)
    att1 = jax.random.normal(k2, (B, C, H, W), jnp.float32)
    gt = jax.random.uniform(k3, (B, C, H, W), jnp.float32)
    gt = gt.at[:, :, 4:6, 4:6].set(1.0)                  # exact positives
    outs = [att0, att1]
    loss = jax.block_until_ready(atts_loss(outs, gt))
    ref = jax.block_until_ready(_ref_atts_loss(outs, gt))
    np.testing.assert_allclose(np.asarray(loss), np.asarray(ref),
                               rtol=1e-4, atol=1e-4)

    # Case 2: ragged (non-multiple-of-1024) bf16 preds to exercise the pad path.
    B2, C2, H2, W2 = 1, 3, 15, 15
    a0 = jax.random.normal(k4, (B2, C2, H2, W2), jnp.float32).astype(jnp.bfloat16)
    a1 = jax.random.normal(k5, (B2, C2, H2, W2), jnp.float32).astype(jnp.bfloat16)
    gt2 = jax.random.uniform(k6, (B2, C2, H2, W2), jnp.float32)
    gt2 = gt2.at[:, :, 7, 7].set(1.0)
    outs2 = [a0, a1]
    loss2 = jax.block_until_ready(atts_loss(outs2, gt2))
    ref2 = jax.block_until_ready(_ref_atts_loss(outs2, gt2))
    np.testing.assert_allclose(np.asarray(loss2), np.asarray(ref2),
                               rtol=1e-4, atol=1e-4)

    print("KERNEL_OK")
</pallas_src>

<mosaic_0001>
module attributes {stable_mosaic.version = 11 : i64} {
  func.func @_atts_loss_kernel(%arg0: i32, %arg1: i32, %arg2: memref<2x8x128xf32, #tpu.memory_space<vmem>>, %arg3: memref<2x8x128xf32, #tpu.memory_space<vmem>>, %arg4: memref<2x8x128xf32, #tpu.memory_space<vmem>>, %arg5: memref<1x2x2x8x128xf32, #tpu.memory_space<vmem>>, %arg6: memref<1x8x128xf32, #tpu.memory_space<vmem>>) attributes {dimension_semantics = [#tpu.dimension_semantics<parallel>, #tpu.dimension_semantics<arbitrary>], iteration_bounds = array<i64: 1, 1>, scalar_prefetch = 0 : i64, scratch_operands = 0 : i64, tpu.core_type = #tpu.core_type<tc>, window_params = [{transform_indices = @transform_0, window_bounds = array<i64: 2, 8, 128>}, {transform_indices = @transform_1, window_bounds = array<i64: 2, 8, 128>}, {transform_indices = @transform_2, window_bounds = array<i64: 2, 8, 128>}, {transform_indices = @transform_3, window_bounds = array<i64: 1, 2, 2, 8, 128>}, {transform_indices = @transform_4, window_bounds = array<i64: 1, 8, 128>}]} {
    %c0_i32 = arith.constant 0 : i32
    %0 = arith.cmpi eq, %arg1, %c0_i32 : i32
    %1 = arith.extui %0 : i1 to i32
    %c0_i32_0 = arith.constant 0 : i32
    %2 = arith.cmpi ne, %1, %c0_i32_0 : i32
    scf.if %2 {
      %cst_87 = arith.constant 0.000000e+00 : f32
      %123 = vector.broadcast %cst_87 : f32 to vector<1x2x2x8x128xf32>
      %c0_88 = arith.constant 0 : index
      %c0_89 = arith.constant 0 : index
      %c0_90 = arith.constant 0 : index
      %c0_91 = arith.constant 0 : index
      %c0_92 = arith.constant 0 : index
      %124 = vector.load %arg5[%c0_88, %c0_89, %c0_90, %c0_91, %c0_92] : memref<1x2x2x8x128xf32, #tpu.memory_space<vmem>>, vector<1x2x2x8x128xf32>
      tpu.vector_store %arg5[%c0_88, %c0_89, %c0_90, %c0_91, %c0_92], %123 {strides = array<i32>} : memref<1x2x2x8x128xf32, #tpu.memory_space<vmem>>, vector<1x2x2x8x128xf32>,
      %cst_93 = arith.constant 0.000000e+00 : f32
      %125 = vector.broadcast %cst_93 : f32 to vector<1x8x128xf32>
      %c0_94 = arith.constant 0 : index
      %c0_95 = arith.constant 0 : index
      %c0_96 = arith.constant 0 : index
      %126 = vector.load %arg6[%c0_94, %c0_95, %c0_96] : memref<1x8x128xf32, #tpu.memory_space<vmem>>, vector<1x8x128xf32>
      tpu.vector_store %arg6[%c0_94, %c0_95, %c0_96], %125 {strides = array<i32>} : memref<1x8x128xf32, #tpu.memory_space<vmem>>, vector<1x8x128xf32>,
    } else {
    }
    %c0 = arith.constant 0 : index
    %c0_1 = arith.constant 0 : index
    %c0_2 = arith.constant 0 : index
    %3 = vector.load %arg4[%c0, %c0_1, %c0_2] : memref<2x8x128xf32, #tpu.memory_space<vmem>>, vector<2x8x128xf32>
    %cst = arith.constant 1.000000e+00 : f32
    %4 = vector.broadcast %cst : f32 to vector<2x8x128xf32>
    %5 = arith.cmpf oeq, %3, %4 : vector<2x8x128xf32>
    %cst_3 = arith.constant 1.000000e+00 : f32
    %6 = vector.broadcast %cst_3 : f32 to vector<2x8x128xf32>
    %7 = arith.cmpf olt, %3, %6 : vector<2x8x128xf32>
    %cst_4 = arith.constant 1.000000e+00 : f32
    %8 = vector.broadcast %cst_4 : f32 to vector<2x8x128xf32>
    %9 = arith.subf %8, %3 : vector<2x8x128xf32>
    %10 = arith.mulf %9, %9 : vector<2x8x128xf32>
    %11 = arith.mulf %10, %10 : vector<2x8x128xf32>
    %c0_5 = arith.constant 0 : index
    %c0_6 = arith.constant 0 : index
    %c0_7 = arith.constant 0 : index
    %12 = vector.load %arg6[%c0_5, %c0_6, %c0_7] : memref<1x8x128xf32, #tpu.memory_space<vmem>>, vector<1x8x128xf32>
    %13 = vector.shape_cast %12 : vector<1x8x128xf32> to vector<8x128xf32>
    %14 = arith.extui %5 : vector<2x8x128xi1> to vector<2x8x128xi32>
    %15 = arith.sitofp %14 : vector<2x8x128xi32> to vector<2x8x128xf32>
    %cst_8 = arith.constant dense<0.000000e+00> : vector<8x128xf32>
    %16 = vector.multi_reduction <add>, %15, %cst_8 [0] : vector<2x8x128xf32> to vector<8x128xf32>
    %17 = arith.addf %13, %16 : vector<8x128xf32>
    %c0_9 = arith.constant 0 : index
    %c0_10 = arith.constant 0 : index
    %c0_11 = arith.constant 0 : index
    %18 = vector.load %arg6[%c0_9, %c0_10, %c0_11] : memref<1x8x128xf32, #tpu.memory_space<vmem>>, vector<1x8x128xf32>
    %19 = vector.shape_cast %18 : vector<1x8x128xf32> to vector<8x128xf32>
    %20 = vector.shape_cast %17 : vector<8x128xf32> to vector<1x8x128xf32>
    tpu.vector_store %arg6[%c0_9, %c0_10, %c0_11], %20 {strides = array<i32>} : memref<1x8x128xf32, #tpu.memory_space<vmem>>, vector<1x8x128xf32>,
    %c0_12 = arith.constant 0 : index
    %c0_13 = arith.constant 0 : index
    %c0_14 = arith.constant 0 : index
    %21 = vector.load %arg2[%c0_12, %c0_13, %c0_14] : memref<2x8x128xf32, #tpu.memory_space<vmem>>, vector<2x8x128xf32>
    %22 = math.absf %21 : vector<2x8x128xf32>
    %cst_15 = arith.constant 0.000000e+00 : f32
    %23 = vector.broadcast %cst_15 : f32 to vector<2x8x128xf32>
    %24 = arith.subf %23, %22 : vector<2x8x128xf32>
    %25 = math.exp %24 : vector<2x8x128xf32>
    %cst_16 = arith.constant 1.000000e+00 : f32
    %26 = vector.broadcast %cst_16 : f32 to vector<2x8x128xf32>
    %27 = arith.addf %26, %25 : vector<2x8x128xf32>
    %28 = math.log %27 : vector<2x8x128xf32>
    %cst_17 = arith.constant 0.000000e+00 : f32
    %29 = vector.broadcast %cst_17 : f32 to vector<2x8x128xf32>
    %30 = arith.minimumf %21, %29 : vector<2x8x128xf32>
    %31 = arith.subf %30, %28 : vector<2x8x128xf32>
    %cst_18 = arith.constant -9.21034049 : f32
    %cst_19 = arith.constant -1.000050e-04 : f32
    %32 = vector.broadcast %cst_18 : f32 to vector<2x8x128xf32>
    %33 = arith.maximumf %32, %31 : vector<2x8x128xf32>
    %34 = vector.broadcast %cst_19 : f32 to vector<2x8x128xf32>
    %35 = arith.minimumf %34, %33 : vector<2x8x128xf32>
    %cst_20 = arith.constant 0.000000e+00 : f32
    %36 = vector.broadcast %cst_20 : f32 to vector<2x8x128xf32>
    %37 = arith.subf %36, %21 : vector<2x8x128xf32>
    %cst_21 = arith.constant 0.000000e+00 : f32
    %38 = vector.broadcast %cst_21 : f32 to vector<2x8x128xf32>
    %39 = arith.minimumf %37, %38 : vector<2x8x128xf32>
    %40 = arith.subf %39, %28 : vector<2x8x128xf32>
    %cst_22 = arith.constant -9.21034049 : f32
    %cst_23 = arith.constant -1.000050e-04 : f32
    %41 = vector.broadcast %cst_22 : f32 to vector<2x8x128xf32>
    %42 = arith.maximumf %41, %40 : vector<2x8x128xf32>
    %43 = vector.broadcast %cst_23 : f32 to vector<2x8x128xf32>
    %44 = arith.minimumf %43, %42 : vector<2x8x128xf32>
    %cst_24 = arith.constant 2.000000e+00 : f32
    %45 = vector.broadcast %cst_24 : f32 to vector<2x8x128xf32>
    %46 = arith.mulf %45, %44 : vector<2x8x128xf32>
    %47 = math.exp %46 : vector<2x8x128xf32>
    %cst_25 = arith.constant 2.000000e+00 : f32
    %48 = vector.broadcast %cst_25 : f32 to vector<2x8x128xf32>
    %49 = arith.mulf %48, %35 : vector<2x8x128xf32>
    %50 = math.exp %49 : vector<2x8x128xf32>
    %51 = arith.mulf %35, %47 : vector<2x8x128xf32>
    %cst_26 = arith.constant 0.000000e+00 : f32
    %52 = vector.broadcast %cst_26 : f32 to vector<2x8x128xf32>
    %53 = arith.select %5, %51, %52 : vector<2x8x128xi1>, vector<2x8x128xf32>
    %54 = arith.mulf %44, %50 : vector<2x8x128xf32>
    %55 = arith.mulf %54, %11 : vector<2x8x128xf32>
    %cst_27 = arith.constant 0.000000e+00 : f32
    %56 = vector.broadcast %cst_27 : f32 to vector<2x8x128xf32>
    %57 = arith.select %7, %55, %56 : vector<2x8x128xi1>, vector<2x8x128xf32>
    %c0_28 = arith.constant 0 : index
    %c0_29 = arith.constant 0 : index
    %c0_30 = arith.constant 0 : index
    %c0_31 = arith.constant 0 : index
    %c0_32 = arith.constant 0 : index
    %58 = vector.load %arg5[%c0_28, %c0_29, %c0_30, %c0_31, %c0_32] : memref<1x2x2x8x128xf32, #tpu.memory_space<vmem>>, vector<1x1x1x8x128xf32>
    %59 = vector.shape_cast %58 : vector<1x1x1x8x128xf32> to vector<8x128xf32>
    %cst_33 = arith.constant dense<0.000000e+00> : vector<8x128xf32>
    %60 = vector.multi_reduction <add>, %53, %cst_33 [0] : vector<2x8x128xf32> to vector<8x128xf32>
    %61 = arith.addf %59, %60 : vector<8x128xf32>
    %c0_34 = arith.constant 0 : index
    %c0_35 = arith.constant 0 : index
    %c0_36 = arith.constant 0 : index
    %c0_37 = arith.constant 0 : index
    %c0_38 = arith.constant 0 : index
    %62 = vector.load %arg5[%c0_34, %c0_35, %c0_36, %c0_37, %c0_38] : memref<1x2x2x8x128xf32, #tpu.memory_space<vmem>>, vector<1x1x1x8x128xf32>
    %63 = vector.shape_cast %62 : vector<1x1x1x8x128xf32> to vector<8x128xf32>
    %64 = vector.shape_cast %61 : vector<8x128xf32> to vector<1x1x1x8x128xf32>
    tpu.vector_store %arg5[%c0_34, %c0_35, %c0_36, %c0_37, %c0_38], %64 {strides = array<i32>} : memref<1x2x2x8x128xf32, #tpu.memory_space<vmem>>, vector<1x1x1x8x128xf32>,
    %c0_39 = arith.constant 0 : index
    %c0_40 = arith.constant 0 : index
    %c1 = arith.constant 1 : index
    %c0_41 = arith.constant 0 : index
    %c0_42 = arith.constant 0 : index
    %65 = vector.load %arg5[%c0_39, %c0_40, %c1, %c0_41, %c0_42] : memref<1x2x2x8x128xf32, #tpu.memory_space<vmem>>, vector<1x1x1x8x128xf32>
    %66 = vector.shape_cast %65 : vector<1x1x1x8x128xf32> to vector<8x128xf32>
    %cst_43 = arith.constant dense<0.000000e+00> : vector<8x128xf32>
    %67 = vector.multi_reduction <add>, %57, %cst_43 [0] : vector<2x8x128xf32> to vector<8x128xf32>
    %68 = arith.addf %66, %67 : vector<8x128xf32>
    %c0_44 = arith.constant 0 : index
    %c0_45 = arith.constant 0 : index
    %c1_46 = arith.constant 1 : index
    %c0_47 = arith.constant 0 : index
    %c0_48 = arith.constant 0 : index
    %69 = vector.load %arg5[%c0_44, %c0_45, %c1_46, %c0_47, %c0_48] : memref<1x2x2x8x128xf32, #tpu.memory_space<vmem>>, vector<1x1x1x8x128xf32>
    %70 = vector.shape_cast %69 : vector<1x1x1x8x128xf32> to vector<8x128xf32>
    %71 = vector.shape_cast %68 : vector<8x128xf32> to vector<1x1x1x8x128xf32>
    tpu.vector_store %arg5[%c0_44, %c0_45, %c1_46, %c0_47, %c0_48], %71 {strides = array<i32>} : memref<1x2x2x8x128xf32, #tpu.memory_space<vmem>>, vector<1x1x1x8x128xf32>,
    %c0_49 = arith.constant 0 : index
    %c0_50 = arith.constant 0 : index
    %c0_51 = arith.constant 0 : index
    %72 = vector.load %arg3[%c0_49, %c0_50, %c0_51] : memref<2x8x128xf32, #tpu.memory_space<vmem>>, vector<2x8x128xf32>
    %73 = math.absf %72 : vector<2x8x128xf32>
    %cst_52 = arith.constant 0.000000e+00 : f32
    %74 = vector.broadcast %cst_52 : f32 to vector<2x8x128xf32>
    %75 = arith.subf %74, %73 : vector<2x8x128xf32>
    %76 = math.exp %75 : vector<2x8x128xf32>
    %cst_53 = arith.constant 1.000000e+00 : f32
    %77 = vector.broadcast %cst_53 : f32 to vector<2x8x128xf32>
    %78 = arith.addf %77, %76 : vector<2x8x128xf32>
    %79 = math.log %78 : vector<2x8x128xf32>
    %cst_54 = arith.constant 0.000000e+00 : f32
    %80 = vector.broadcast %cst_54 : f32 to vector<2x8x128xf32>
    %81 = arith.minimumf %72, %80 : vector<2x8x128xf32>
    %82 = arith.subf %81, %79 : vector<2x8x128xf32>
    %cst_55 = arith.constant -9.21034049 : f32
    %cst_56 = arith.constant -1.000050e-04 : f32
    %83 = vector.broadcast %cst_55 : f32 to vector<2x8x128xf32>
    %84 = arith.maximumf %83, %82 : vector<2x8x128xf32>
    %85 = vector.broadcast %cst_56 : f32 to vector<2x8x128xf32>
    %86 = arith.minimumf %85, %84 : vector<2x8x128xf32>
    %cst_57 = arith.constant 0.000000e+00 : f32
    %87 = vector.broadcast %cst_57 : f32 to vector<2x8x128xf32>
    %88 = arith.subf %87, %72 : vector<2x8x128xf32>
    %cst_58 = arith.constant 0.000000e+00 : f32
    %89 = vector.broadcast %cst_58 : f32 to vector<2x8x128xf32>
    %90 = arith.minimumf %88, %89 : vector<2x8x128xf32>
    %91 = arith.subf %90, %79 : vector<2x8x128xf32>
    %cst_59 = arith.constant -9.21034049 : f32
    %cst_60 = arith.constant -1.000050e-04 : f32
    %92 = vector.broadcast %cst_59 : f32 to vector<2x8x128xf32>
    %93 = arith.maximumf %92, %91 : vector<2x8x128xf32>
    %94 = vector.broadcast %cst_60 : f32 to vector<2x8x128xf32>
    %95 = arith.minimumf %94, %93 : vector<2x8x128xf32>
    %cst_61 = arith.constant 2.000000e+00 : f32
    %96 = vector.broadcast %cst_61 : f32 to vector<2x8x128xf32>
    %97 = arith.mulf %96, %95 : vector<2x8x128xf32>
    %98 = math.exp %97 : vector<2x8x128xf32>
    %cst_62 = arith.constant 2.000000e+00 : f32
    %99 = vector.broadcast %cst_62 : f32 to vector<2x8x128xf32>
    %100 = arith.mulf %99, %86 : vector<2x8x128xf32>
    %101 = math.exp %100 : vector<2x8x128xf32>
    %102 = arith.mulf %86, %98 : vector<2x8x128xf32>
    %cst_63 = arith.constant 0.000000e+00 : f32
    %103 = vector.broadcast %cst_63 : f32 to vector<2x8x128xf32>
    %104 = arith.select %5, %102, %103 : vector<2x8x128xi1>, vector<2x8x128xf32>
    %105 = arith.mulf %95, %101 : vector<2x8x128xf32>
    %106 = arith.mulf %105, %11 : vector<2x8x128xf32>
    %cst_64 = arith.constant 0.000000e+00 : f32
    %107 = vector.broadcast %cst_64 : f32 to vector<2x8x128xf32>
    %108 = arith.select %7, %106, %107 : vector<2x8x128xi1>, vector<2x8x128xf32>
    %c0_65 = arith.constant 0 : index
    %c1_66 = arith.constant 1 : index
    %c0_67 = arith.constant 0 : index
    %c0_68 = arith.constant 0 : index
    %c0_69 = arith.constant 0 : index
    %109 = vector.load %arg5[%c0_65, %c1_66, %c0_67, %c0_68, %c0_69] : memref<1x2x2x8x128xf32, #tpu.memory_space<vmem>>, vector<1x1x1x8x128xf32>
    %110 = vector.shape_cast %109 : vector<1x1x1x8x128xf32> to vector<8x128xf32>
    %cst_70 = arith.constant dense<0.000000e+00> : vector<8x128xf32>
    %111 = vector.multi_reduction <add>, %104, %cst_70 [0] : vector<2x8x128xf32> to vector<8x128xf32>
    %112 = arith.addf %110, %111 : vector<8x128xf32>
    %c0_71 = arith.constant 0 : index
    %c1_72 = arith.constant 1 : index
    %c0_73 = arith.constant 0 : index
    %c0_74 = arith.constant 0 : index
    %c0_75 = arith.constant 0 : index
    %113 = vector.load %arg5[%c0_71, %c1_72, %c0_73, %c0_74, %c0_75] : memref<1x2x2x8x128xf32, #tpu.memory_space<vmem>>, vector<1x1x1x8x128xf32>
    %114 = vector.shape_cast %113 : vector<1x1x1x8x128xf32> to vector<8x128xf32>
    %115 = vector.shape_cast %112 : vector<8x128xf32> to vector<1x1x1x8x128xf32>
    tpu.vector_store %arg5[%c0_71, %c1_72, %c0_73, %c0_74, %c0_75], %115 {strides = array<i32>} : memref<1x2x2x8x128xf32, #tpu.memory_space<vmem>>, vector<1x1x1x8x128xf32>,
    %c0_76 = arith.constant 0 : index
    %c1_77 = arith.constant 1 : index
    %c1_78 = arith.constant 1 : index
    %c0_79 = arith.constant 0 : index
    %c0_80 = arith.constant 0 : index
    %116 = vector.load %arg5[%c0_76, %c1_77, %c1_78, %c0_79, %c0_80] : memref<1x2x2x8x128xf32, #tpu.memory_space<vmem>>, vector<1x1x1x8x128xf32>
    %117 = vector.shape_cast %116 : vector<1x1x1x8x128xf32> to vector<8x128xf32>
    %cst_81 = arith.constant dense<0.000000e+00> : vector<8x128xf32>
    %118 = vector.multi_reduction <add>, %108, %cst_81 [0] : vector<2x8x128xf32> to vector<8x128xf32>
    %119 = arith.addf %117, %118 : vector<8x128xf32>
    %c0_82 = arith.constant 0 : index
    %c1_83 = arith.constant 1 : index
    %c1_84 = arith.constant 1 : index
    %c0_85 = arith.constant 0 : index
    %c0_86 = arith.constant 0 : index
    %120 = vector.load %arg5[%c0_82, %c1_83, %c1_84, %c0_85, %c0_86] : memref<1x2x2x8x128xf32, #tpu.memory_space<vmem>>, vector<1x1x1x8x128xf32>
    %121 = vector.shape_cast %120 : vector<1x1x1x8x128xf32> to vector<8x128xf32>
    %122 = vector.shape_cast %119 : vector<8x128xf32> to vector<1x1x1x8x128xf32>
    tpu.vector_store %arg5[%c0_82, %c1_83, %c1_84, %c0_85, %c0_86], %122 {strides = array<i32>} : memref<1x2x2x8x128xf32, #tpu.memory_space<vmem>>, vector<1x1x1x8x128xf32>,
    return
  }
  func.func @transform_0(%arg0: i32, %arg1: i32) -> (i32, i32, i32) {
    %c1_i32 = arith.constant 1 : i32
    %0 = arith.muli %arg0, %c1_i32 : i32
    %1 = arith.addi %0, %arg1 : i32
    %c0_i32 = arith.constant 0 : i32
    %2 = arith.minsi %1, %c0_i32 : i32
    %c0_i32_0 = arith.constant 0 : i32
    %c0_i32_1 = arith.constant 0 : i32
    %c0_i32_2 = arith.constant 0 : i32
    return %2, %c0_i32_0, %c0_i32_1 : i32, i32, i32
  }
  func.func @transform_1(%arg0: i32, %arg1: i32) -> (i32, i32, i32) {
    %c1_i32 = arith.constant 1 : i32
    %0 = arith.muli %arg0, %c1_i32 : i32
    %1 = arith.addi %0, %arg1 : i32
    %c0_i32 = arith.constant 0 : i32
    %2 = arith.minsi %1, %c0_i32 : i32
    %c0_i32_0 = arith.constant 0 : i32
    %c0_i32_1 = arith.constant 0 : i32
    %c0_i32_2 = arith.constant 0 : i32
    return %2, %c0_i32_0, %c0_i32_1 : i32, i32, i32
  }
  func.func @transform_2(%arg0: i32, %arg1: i32) -> (i32, i32, i32) {
    %c1_i32 = arith.constant 1 : i32
    %0 = arith.muli %arg0, %c1_i32 : i32
    %1 = arith.addi %0, %arg1 : i32
    %c0_i32 = arith.constant 0 : i32
    %2 = arith.minsi %1, %c0_i32 : i32
    %c0_i32_0 = arith.constant 0 : i32
    %c0_i32_1 = arith.constant 0 : i32
    %c0_i32_2 = arith.constant 0 : i32
    return %2, %c0_i32_0, %c0_i32_1 : i32, i32, i32
  }
  func.func @transform_3(%arg0: i32, %arg1: i32) -> (i32, i32, i32, i32, i32) {
    %c0_i32 = arith.constant 0 : i32
    %c0_i32_0 = arith.constant 0 : i32
    %c0_i32_1 = arith.constant 0 : i32
    %c0_i32_2 = arith.constant 0 : i32
    %c0_i32_3 = arith.constant 0 : i32
    return %arg0, %c0_i32, %c0_i32_0, %c0_i32_1, %c0_i32_2 : i32, i32, i32, i32, i32
  }
  func.func @transform_4(%arg0: i32, %arg1: i32) -> (i32, i32, i32) {
    %c0_i32 = arith.constant 0 : i32
    %c0_i32_0 = arith.constant 0 : i32
    %c0_i32_1 = arith.constant 0 : i32
    return %arg0, %c0_i32, %c0_i32_0 : i32, i32, i32
  }
}

</mosaic_0001>

<bundles_post_ra>
// kernel: tpu_custom_call.1
= control target key start
LH: loop header
LB: loop body
LE: loop exit
PB: predicated region body
PF: predicated region fallthrough
CT: control target
= control target key end

     0   :  { %10 = vsyncpa [#allocation3], 0  ;;  %s542_s0 = inlined_call_operand.hbm [shape: f32[2,8,128], index: 0, kind: input, shape index: {}]   ;;  %s543_s1 = inlined_call_operand.hbm [shape: f32[2,8,128], index: 1, kind: input, shape index: {}]   ;;  %s544_s2 = inlined_call_operand.hbm [shape: f32[2,8,128], index: 2, kind: input, shape index: {}]   ;;  %s545_s3 = inlined_call_operand.hbm [shape: f32[1,2,2,8,128], index: 3, kind: output, shape index: {0}]   ;;  %s546_s4 = inlined_call_operand.hbm [shape: f32[1,8,128], index: 4, kind: output, shape index: {1}]  }
   0x1   :  { %11 = vsyncpa [#allocation6], 0 }
   0x2   :  { %12 = vsyncpa [#allocation4], 0 }
   0x3   :  { %13 = vsyncpa [#allocation10], 0  ;;  %s437_s15 = smov [#allocation5]   ;;  %s438_s17 = smov [#allocation2]  }
   0x4   :  { %s43_s16 = sshll.u32 %s437_s15, 4  ;;  %s25_s18 = sshll.u32 %s438_s17, 4  ;;  %s44_s16 = int_to_ptr.vmem [resolvable:$true] %s43_s16  ;;  %s26_s18 = int_to_ptr.vmem [resolvable:$true] %s25_s18 }
   0x5   :  { %s337_s19 = scalar_lea.vmem %s44_s16, 256  ;;  %p342_p1 = scmp.lt.s32.totalorder %s44_s16, %s44_s16 }
   0x6   :  { %p338_p0 = scmp.ne.s32.totalorder %s44_s16, %s337_s19  ;;  %p343_p2 = scmp.lt.s32.totalorder %s337_s19, %s337_s19 }
   0x8   :  { %p344_p3 = por %p343_p2, %p342_p1 }
   0xa   :  { %p345_p4 = pnand %p344_p3, %p338_p0 }
   0xc   :  { %348 = shalt.err (!%p345_p4)
}
   0xd   :  { %s439_s20 = smov 128   ;;  %s440_s21 = smov 8  }
   0xe   :  { %49 = dma.hbm_to_vmem [thread:$0]  %s543_s1, 256, %s44_s16, [#allocation6], %s439_s20, %s439_s20, %s440_s21  }
   0xf   :  { %s357_s24 = scalar_lea.vmem %s26_s18, 256  ;;  %p362_p6 = scmp.lt.s32.totalorder %s26_s18, %s26_s18 }
  0x10   :  { %p358_p5 = scmp.ne.s32.totalorder %s26_s18, %s357_s24  ;;  %p363_p7 = scmp.lt.s32.totalorder %s357_s24, %s357_s24 }
  0x12   :  { %p364_p8 = por %p363_p7, %p362_p6 }
  0x14   :  { %p365_p9 = pnand %p364_p8, %p358_p5 }
  0x16   :  { %368 = shalt.err (!%p365_p9)
}
  0x17   :  { %31 = dma.hbm_to_vmem [thread:$0]  %s542_s0, 256, %s26_s18, [#allocation3], %s439_s20, %s439_s20, %s440_s21  }
  0x18   :  { %s441_s27 = smov [#allocation7]  }
  0x19   :  { %s61_s28 = sshll.u32 %s441_s27, 4  ;;  %s62_s28 = int_to_ptr.vmem [resolvable:$true] %s61_s28 }
  0x1a   :  { %s377_s29 = scalar_lea.vmem %s62_s28, 256  ;;  %p382_p11 = scmp.lt.s32.totalorder %s62_s28, %s62_s28 }
  0x1b   :  { %p378_p10 = scmp.ne.s32.totalorder %s62_s28, %s377_s29  ;;  %p383_p12 = scmp.lt.s32.totalorder %s377_s29, %s377_s29 }
  0x1d   :  { %p384_p13 = por %p383_p12, %p382_p11 }
  0x1f   :  { %p385_p0 = pnand %p384_p13, %p378_p10 }
  0x21   :  { %388 = shalt.err (!%p385_p0)
}
  0x22   :  { %67 = dma.hbm_to_vmem [thread:$0]  %s544_s2, 256, %s62_s28, [#allocation6], %s439_s20, %s439_s20, %s440_s21  }
  0x23   :  { %429 = dma.done.wait [#allocation3], 256  }
  0x24   :  { %430 = vsyncadd [#allocation3], 4294967040 }
  0x25   :  { %431 = dma.done.wait [#allocation6], 512  }
  0x26   :  { %432 = vsyncadd [#allocation6], 4294966784  ;;  %v488_v0 = vld [vmem:[#allocation7] sm:$0xff]  ;;  %v490_v1 = vld [vmem:[#allocation7 + $0x8] sm:$0xff]  ;;  %v442_v5 = vmov 0.0   ;;  %s443_s0 = smov [#allocation9]  }
  0x27   :  { %v492_v2 = vld [vmem:[#allocation2] sm:$0xff]  ;;  %vm100_vm0 = vcmp.eq.f32.partialorder %v488_v0, 1.0  ;;  %vm101_vm1 = vcmp.eq.f32.partialorder %v490_v1, 1.0  ;;  %v119_v3 = vld [vmem:[#allocation2 + $0x8] sm:$0xff]  ;;  %s267_s2 = sshll.u32 %s443_s0, 4  ;;  %v501_v11 = vld [vmem:[#allocation5] sm:$0xff]  ;;  %s268_s2 = int_to_ptr.vmem [resolvable:$true] %s267_s2 }
  0x28   :  { %v120_v4 = vand.u32 2147483647, %v492_v2  ;;  %v287_v6 = vsel %vm100_vm0, 1.0, %v442_v5  ;;  %v288_v7 = vsel %vm101_vm1, 1.0, %v442_v5  ;;  %v121_v8 = vand.u32 2147483647, %v119_v3  ;;  %p394_p2 = scmp.lt.s32.totalorder %s268_s2, %s268_s2 }
  0x29   :  { %v115_v9 = vadd.f32 %v288_v7, %v287_v6  ;;  %v503_v13 = vld [vmem:[#allocation5 + $0x8] sm:$0xff]  ;;  %v185_v16 = vand.u32 2147483647, %v501_v11  ;;  %s389_s5 = scalar_lea.vmem %s268_s2, 128 }
  0x2a   :  { %v122_v10 = vsub.f32 0.0, %v120_v4  ;;  %v123_v12 = vsub.f32 0.0, %v121_v8  ;;  %v186_v17 = vand.u32 2147483647, %v503_v13  ;;  %p390_p1 = scmp.ne.s32.totalorder %s268_s2, %s389_s5  ;;  %p395_p3 = scmp.lt.s32.totalorder %s389_s5, %s389_s5 }
  0x2b   :  { %117 = vst [vmem:[#allocation9] sm:$0xff] %v115_v9  ;;  %v187_v18 = vsub.f32 0.0, %v185_v16 }
  0x2c   :  { %v124_v14 = vmul.f32 1.442695, %v122_v10  ;;  %v126_v15 = vmul.f32 1.442695, %v123_v12  ;;  %p396_p4 = por %p395_p3, %p394_p2 }
  0x2e   :  { %297 = vpow2.f32 %v124_v14  ;;  %p397_p5 = pnand %p396_p4, %p390_p1 }
  0x2f   :  { %299 = vpow2.f32 %v126_v15 }
  0x30   :  { %400 = shalt.err (!%p397_p5)
}
  0x31   :  { %270 = dma.vmem_to_hbm [thread:$0]  %s268_s2, 128, %s546_s4, [#allocation10]   ;;  %v188_v19 = vsub.f32 0.0, %v186_v17  ;;  %v189_v20 = vmul.f32 1.442695, %v187_v18  ;;  %v142_v30 = vsub.f32 0.0, %v492_v2 }
  0x32   :  { %v143_v31 = vsub.f32 0.0, %v119_v3  ;;  %v134_v32 = vmin.f32 %v492_v2, 0.0  ;;  %v135_v35 = vmin.f32 %v119_v3, 0.0  ;;  %v207_v37 = vsub.f32 0.0, %v501_v11  ;;  %s444_s4 = smov [#allocation8]  }
  0x33   :  { %v191_v21 = vmul.f32 1.442695, %v188_v19  ;;  %301 = vpow2.f32 %v189_v20  ;;  %v144_v33 = vmin.f32 %v142_v30, 0.0  ;;  %v208_v40 = vsub.f32 0.0, %v503_v13  ;;  %s254_s8 = sshll.u32 %s444_s4, 4  ;;  %s255_s8 = int_to_ptr.vmem [resolvable:$true] %s254_s8 }
  0x34   :  { %v145_v36 = vmin.f32 %v143_v31, 0.0  ;;  %v199_v46 = vmin.f32 %v501_v11, 0.0  ;;  %v209_v47 = vmin.f32 %v207_v37, 0.0  ;;  %v200_v51 = vmin.f32 %v503_v13, 0.0  ;;  %s409_s9 = scalar_lea.vmem %s255_s8, 512  ;;  %p414_p7 = scmp.lt.s32.totalorder %s255_s8, %s255_s8 }
  0x35   :  { %303 = vpow2.f32 %v191_v21  ;;  %v210_v52 = vmin.f32 %v208_v40, 0.0  ;;  %vm102_vm2 = vcmp.lt.f32.partialorder %v488_v0, 1.0  ;;  %vm103_vm3 = vcmp.lt.f32.partialorder %v490_v1, 1.0  ;;  %p410_p6 = scmp.ne.s32.totalorder %s255_s8, %s409_s9  ;;  %p415_p8 = scmp.lt.s32.totalorder %s409_s9, %s409_s9 }
  0x37   :  { %p416_p9 = por %p415_p8, %p414_p7 }
  0x39   :  { %p417_p10 = pnand %p416_p9, %p410_p6 }
  0x3b   :  { %v298_v22 = vpop.eup %297 }
  0x3c   :  { %v300_v23 = vpop.eup %299  ;;  %v128_v24 = vadd.f32 1.0, %v298_v22 }
  0x3d   :  { %v129_v25 = vadd.f32 1.0, %v300_v23 }
  0x3e   :  { %305 = vlog2.f32 %v128_v24 }
  0x3f   :  { %307 = vlog2.f32 %v129_v25 }
  0x40   :  { %v302_v26 = vpop.eup %301 }
  0x41   :  { %v193_v28 = vadd.f32 1.0, %v302_v26 }
  0x42   :  { %v304_v27 = vpop.eup %303 }
  0x43   :  { %v194_v29 = vadd.f32 1.0, %v304_v27  ;;  %309 = vlog2.f32 %v193_v28  ;;  %v104_v27 = vsub.f32 1.0, %v488_v0 }
  0x45   :  { %311 = vlog2.f32 %v194_v29  ;;  %v105_v29 = vsub.f32 1.0, %v490_v1  ;;  %v106_v30 = vmul.f32 %v104_v27, %v104_v27 }
  0x47   :  { %v107_v31 = vmul.f32 %v105_v29, %v105_v29 }
  0x4b   :  { %v306_v34 = vpop.eup %305 }
  0x4c   :  { %v308_v38 = vpop.eup %307  ;;  %v131_v39 = vmul.f32 0.6931472, %v306_v34 }
  0x4d   :  { %v133_v41 = vmul.f32 0.6931472, %v308_v38  ;;  %v109_v38 = vmul.f32 %v107_v31, %v107_v31 }
  0x4e   :  { %v136_v42 = vsub.f32 %v134_v32, %v131_v39  ;;  %v146_v43 = vsub.f32 %v144_v33, %v131_v39 }
  0x4f   :  { %v137_v44 = vsub.f32 %v135_v35, %v133_v41  ;;  %v147_v45 = vsub.f32 %v145_v36, %v133_v41  ;;  %v108_v35 = vmul.f32 %v106_v30, %v106_v30 }
  0x50   :  { %v310_v48 = vpop.eup %309  ;;  %v138_v49 = vmax.f32 %v136_v42, -9.2103405  ;;  %v148_v50 = vmax.f32 %v146_v43, -9.2103405 }
  0x51   :  { %v139_v54 = vmax.f32 %v137_v44, -9.2103405  ;;  %v149_v55 = vmax.f32 %v147_v45, -9.2103405  ;;  %v196_v56 = vmul.f32 0.6931472, %v310_v48 }
  0x52   :  { %v312_v53 = vpop.eup %311  ;;  %v140_v57 = vmin.f32 %v138_v49, -0.000100005  ;;  %v150_v58 = vmin.f32 %v148_v50, -0.000100005 }
  0x53   :  { %v198_v59 = vmul.f32 0.6931472, %v312_v53  ;;  %v141_v60 = vmin.f32 %v139_v54, -0.000100005  ;;  %v151_v61 = vmin.f32 %v149_v55, -0.000100005  ;;  %v201_v62 = vsub.f32 %v199_v46, %v196_v56 }
  0x54   :  { %v211_v63 = vsub.f32 %v209_v47, %v196_v56  ;;  %v152_v2 = vmul.f32 2.0, %v150_v58  ;;  %v158_v3 = vmul.f32 2.0, %v140_v57 }
  0x55   :  { %v202_v4 = vsub.f32 %v200_v51, %v198_v59  ;;  %v212_v5 = vsub.f32 %v210_v52, %v198_v59  ;;  %v153_v6 = vmul.f32 2.0, %v151_v61  ;;  %v159_v7 = vmul.f32 2.0, %v141_v60 }
  0x56   :  { %v203_v8 = vmax.f32 %v201_v62, -9.2103405  ;;  %v213_v9 = vmax.f32 %v211_v63, -9.2103405  ;;  %v154_v10 = vmul.f32 1.442695, %v152_v2 }
  0x57   :  { %v160_v11 = vmul.f32 1.442695, %v158_v3  ;;  %v204_v12 = vmax.f32 %v202_v4, -9.2103405  ;;  %v156_v13 = vmul.f32 1.442695, %v153_v6 }
  0x58   :  { %v162_v14 = vmul.f32 1.442695, %v159_v7  ;;  %v205_v15 = vmin.f32 %v203_v8, -0.000100005  ;;  %313 = vpow2.f32 %v154_v10  ;;  %v214_v17 = vmax.f32 %v212_v5, -9.2103405 }
  0x59   :  { %v206_v16 = vmin.f32 %v204_v12, -0.000100005  ;;  %v215_v18 = vmin.f32 %v213_v9, -0.000100005  ;;  %315 = vpow2.f32 %v156_v13 }
  0x5a   :  { %v223_v19 = vmul.f32 2.0, %v205_v15  ;;  %317 = vpow2.f32 %v160_v11  ;;  %v216_v20 = vmin.f32 %v214_v17, -0.000100005 }
  0x5b   :  { %v217_v21 = vmul.f32 2.0, %v215_v18  ;;  %v224_v22 = vmul.f32 2.0, %v206_v16  ;;  %319 = vpow2.f32 %v162_v14 }
  0x5c   :  { %v225_v23 = vmul.f32 1.442695, %v223_v19  ;;  %v218_v24 = vmul.f32 2.0, %v216_v20 }
  0x5d   :  { %v219_v25 = vmul.f32 1.442695, %v217_v21  ;;  %v227_v26 = vmul.f32 1.442695, %v224_v22 }
  0x5e   :  { %321 = vpow2.f32 %v225_v23  ;;  %v221_v28 = vmul.f32 1.442695, %v218_v24 }
  0x5f   :  { %323 = vpow2.f32 %v219_v25 }
  0x60   :  { %325 = vpow2.f32 %v227_v26 }
  0x61   :  { %327 = vpow2.f32 %v221_v28 }
  0x65   :  { %v314_v32 = vpop.eup %313 }
  0x66   :  { %v316_v33 = vpop.eup %315  ;;  %v164_v34 = vmul.f32 %v314_v32, %v140_v57 }
  0x67   :  { %v318_v36 = vpop.eup %317  ;;  %v165_v37 = vmul.f32 %v316_v33, %v141_v60 }
  0x68   :  { %v320_v39 = vpop.eup %319  ;;  %v166_v40 = vsel %vm100_vm0, %v164_v34, 0.0  ;;  %v168_v41 = vmul.f32 %v318_v36, %v150_v58 }
  0x69   :  { %v167_v42 = vsel %vm101_vm1, %v165_v37, 0.0  ;;  %v169_v43 = vmul.f32 %v320_v39, %v151_v61 }
  0x6a   :  { %v175_v45 = vadd.f32 %v167_v42, %v166_v40  ;;  %v170_v46 = vmul.f32 %v168_v41, %v108_v35 }
  0x6b   :  { %v322_v44 = vpop.eup %321  ;;  %v171_v48 = vmul.f32 %v169_v43, %v109_v38 }
  0x6c   :  { %v324_v47 = vpop.eup %323  ;;  %v233_v49 = vmul.f32 %v322_v44, %v215_v18  ;;  %v172_v51 = vsel %vm102_vm2, %v170_v46, 0.0  ;;  %177 = vst [vmem:[#allocation8] sm:$0xff] %v175_v45 }
  0x6d   :  { %v326_v50 = vpop.eup %325  ;;  %v229_v52 = vmul.f32 %v324_v47, %v205_v15  ;;  %v173_v54 = vsel %vm103_vm3, %v171_v48, 0.0 }
  0x6e   :  { %v328_v53 = vpop.eup %327  ;;  %v234_v55 = vmul.f32 %v326_v50, %v216_v20  ;;  %v235_v56 = vmul.f32 %v233_v49, %v108_v35  ;;  %v180_v57 = vadd.f32 %v173_v54, %v172_v51 }
  0x6f   :  { %v230_v58 = vmul.f32 %v328_v53, %v206_v16  ;;  %v231_v59 = vsel %vm100_vm0, %v229_v52, 0.0 }
  0x70   :  { %v236_v60 = vmul.f32 %v234_v55, %v109_v38  ;;  %v237_v61 = vsel %vm102_vm2, %v235_v56, 0.0  ;;  %182 = vst [vmem:[#allocation8 + $0x8] sm:$0xff] %v180_v57 }
  0x71   :  { %v232_v62 = vsel %vm101_vm1, %v230_v58, 0.0 }
  0x72   :  { %v241_v63 = vadd.f32 %v232_v62, %v231_v59  ;;  %v238_v2 = vsel %vm103_vm3, %v236_v60, 0.0 }
  0x73   :  { %v246_v3 = vadd.f32 %v238_v2, %v237_v61 }
  0x74   :  { %243 = vst [vmem:[#allocation8 + $0x10] sm:$0xff] %v241_v63 }
  0x75   :  { %248 = vst [vmem:[#allocation8 + $0x18] sm:$0xff] %v246_v3 }
  0x76   :  { %420 = shalt.err (!%p417_p10)
}
  0x77   :  { %260 = dma.vmem_to_hbm [thread:$0]  %s255_s8, 512, %s545_s3, [#allocation4], %s439_s20, %s439_s20, %s440_s21  }
  0x78   :  { %433 = dma.done.wait [#allocation4], 512  }
  0x79   :  { %434 = vsyncadd [#allocation4], 4294966784 }
  0x7a   :  { %435 = dma.done.wait [#allocation10], 128  }
  0x7b   :  { %436 = vsyncadd [#allocation10], 4294967168 }
  0x7c   :  { %277 = vsyncpa [#allocation3], 1 }
  0x7d   :  { %278 = vsyncpa [#allocation6], 1 }
  0x7e   :  { %279 = vsyncpa [#allocation4], 1 }
  0x7f   :  { %280 = vsyncpa [#allocation10], 1 }

</bundles_post_ra>
